<compile_context>
chip_gen: v7x
topology: tpu7x:2x2x1
jax: 0.10.0
libtpu: 0.0.40
codegen_flags: <defaults>
</compile_context>

<pallas_src>
import functools

import jax
import jax.numpy as jnp
from jax import lax
from jax.experimental import pallas as pl
from jax.experimental.pallas import tpu as pltpu


# ----------------------------------------------------------------------------
# Helpers
# ----------------------------------------------------------------------------
def _round_up(x, m):
    return (x + m - 1) // m * m


# ----------------------------------------------------------------------------
# Parameter construction (deterministic, mirrors PolicyNet.__init__)
# ----------------------------------------------------------------------------
def normalized_columns_initializer(key, shape, std):
    """PyTorch: out = randn_like(w); out *= std / sqrt(sum(out**2, dim=0, keepdim))."""
    out = jax.random.normal(key, shape, dtype=jnp.float32)
    return out * (std / jnp.sqrt(jnp.sum(out * out, axis=0, keepdims=True)))


def make_policy_params(key, lstm_hidden_dim, action_size):
    dims = [lstm_hidden_dim, 128, 64, 32, 16, 8, action_size]
    params = []
    for i in range(6):
        key, wk, bk = jax.random.split(key, 3)
        out_d, in_d = dims[i + 1], dims[i]
        # PyTorch weight shape (out, in), re-initialized with normalized columns
        # exactly as the reference module does (sum over dim=0 of (out, in)).
        w = normalized_columns_initializer(wk, (out_d, in_d), std=0.01)
        # PyTorch default bias init: U(-1/sqrt(in), 1/sqrt(in)).
        bound = 1.0 / jnp.sqrt(jnp.float32(in_d))
        b = jax.random.uniform(bk, (out_d,), jnp.float32, -bound, bound)
        params.append((w, b))
    return params


def pack_policy_params(params, weight_dtype=jnp.float32):
    """One-time packing (kept out of the forward path).

    Returns:
      w_slab: (6, pad_in, 128) weights, (in, out)-oriented, zero-padded.
      b_slab: (6, 128) biases, zero-padded, always f32.
    On v6e/v7x pass weight_dtype=jnp.bfloat16 to halve weight bytes.
    """
    lstm_hidden_dim = params[0][0].shape[1]
    action_size = params[-1][0].shape[0]
    assert action_size <= 128, "packed slab assumes action_size <= 128"
    pad_in = max(_round_up(lstm_hidden_dim, 8), 128)

    w_slab = jnp.zeros((6, pad_in, 128), jnp.float32)
    b_slab = jnp.zeros((6, 128), jnp.float32)
    for l, (w, b) in enumerate(params):
        out_d, in_d = w.shape
        w_slab = w_slab.at[l, :in_d, :out_d].set(jnp.transpose(w))
        b_slab = b_slab.at[l, :out_d].set(b)
    return w_slab.astype(weight_dtype), b_slab


# ----------------------------------------------------------------------------
# Pallas kernel: 6 Linear layers + ReLU + masked softmax, all 128-lane padded
# ----------------------------------------------------------------------------
def _policy_kernel(x_ref, w_ref, b_ref, out_ref, *, d_in, action_size):
    w_dtype = w_ref.dtype

    def linear(h, l, rows):
        w = w_ref[l, pl.ds(0, rows), :]                     # (rows, 128)
        b = b_ref[pl.ds(l, 1), :]                           # (1, 128) f32
        y = jnp.dot(h.astype(w_dtype), w, preferred_element_type=jnp.float32)
        return y + b

    h = x_ref[...]                                          # (TB, d_in)
    h = jnp.maximum(linear(h, 0, d_in), 0.0)                # -> (TB, 128)
    for l in range(1, 5):
        h = jnp.maximum(linear(h, l, 128), 0.0)
    logits = linear(h, 5, 128)                              # (TB, 128)

    # Mask padded action columns before the softmax (dim=1 of the real output).
    col = lax.broadcasted_iota(jnp.int32, logits.shape, 1)
    logits = jnp.where(col < action_size, logits, -1e30)

    m = jnp.max(logits, axis=-1, keepdims=True)
    e = jnp.exp(logits - m)
    s = jnp.sum(e, axis=-1, keepdims=True)
    probs = e * pl.reciprocal(s, approx=True)               # EUP, f32
    out_ref[...] = probs[:, :action_size].astype(out_ref.dtype)


# ----------------------------------------------------------------------------
# Forward wrapper
# ----------------------------------------------------------------------------
@functools.partial(jax.jit, static_argnames=("action_size", "batch_tile"))
def policy_net_forward(x, w_slab, b_slab, *, action_size, batch_tile=None):
    """x: (batch, lstm_hidden_dim). Returns (batch, action_size) softmax probs."""
    assert action_size <= 128
    batch, d = x.shape
    d_pad = _round_up(d, 8)

    if batch_tile is None:
        # Big tiles amortize per-step overhead; each x row is only d_pad*4 bytes.
        batch_tile = min(4096, _round_up(batch, 8))
    tb = batch_tile
    batch_pad = _round_up(max(batch, 1), tb)

    pad_b, pad_d = batch_pad - batch, d_pad - d
    if pad_b or pad_d:
        x = jnp.pad(x, ((0, pad_b), (0, pad_d)))
    if w_slab.dtype != jnp.float32:
        x = x.astype(w_slab.dtype)   # bf16 streaming on v6e/v7x (MXU input only)

    grid = (batch_pad // tb,)
    kernel = functools.partial(_policy_kernel, d_in=d_pad, action_size=action_size)

    out = pl.pallas_call(
        kernel,
        out_shape=jax.ShapeDtypeStruct((batch_pad, action_size), jnp.float32),
        grid=grid,
        in_specs=[
            pl.BlockSpec((tb, d_pad), lambda i: (i, 0)),           # streamed x tiles
            pl.BlockSpec(w_slab.shape, lambda i: (0, 0, 0)),       # resident weight slab
            pl.BlockSpec(b_slab.shape, lambda i: (0, 0)),          # resident bias slab
        ],
        out_specs=pl.BlockSpec((tb, action_size), lambda i: (i, 0)),
        compiler_params=pltpu.CompilerParams(
            dimension_semantics=("parallel",),
            vmem_limit_bytes=32 * 1024 * 1024,   # fits v5e(16 MiB default)/v6e/v7x(64 MiB phys)
        ),
    )(x, w_slab, b_slab)

    return out[:batch, :]


# ----------------------------------------------------------------------------
# Reference (pure JAX) for sanity check
# ----------------------------------------------------------------------------
def policy_net_reference(x, params):
    h = x
    for i, (w, b) in enumerate(params):
        h = h @ w.T + b
        if i < len(params) - 1:
            h = jnp.maximum(h, 0.0)
    return jax.nn.softmax(h, axis=1)


if __name__ == "__main__":
    key = jax.random.PRNGKey(0)
    k_params, k_x = jax.random.split(key)

    lstm_hidden_dim = 32
    action_size = 8
    batch = 2

    params = make_policy_params(k_params, lstm_hidden_dim, action_size)
    # One-time packing, outside the forward path.
    # For production on v6e/v7x: pack_policy_params(params, weight_dtype=jnp.bfloat16)
    w_slab, b_slab = pack_policy_params(params, weight_dtype=jnp.float32)

    x = jax.random.normal(k_x, (batch, lstm_hidden_dim), dtype=jnp.float32)

    out = policy_net_forward(x, w_slab, b_slab, action_size=action_size)
    out = jax.block_until_ready(out)

    ref = policy_net_reference(x, params)
    assert out.shape == (batch, action_size)
    assert jnp.allclose(jnp.sum(out, axis=1), 1.0, atol=2e-3)
    assert jnp.allclose(out, ref, atol=2e-3, rtol=2e-3)

    print("KERNEL_OK")
</pallas_src>

<mosaic_0001>
module attributes {stable_mosaic.version = 11 : i64} {
  func.func @_policy_kernel(%arg0: i32, %arg1: memref<8x32xf32, #tpu.memory_space<vmem>>, %arg2: memref<6x128x128xf32, #tpu.memory_space<vmem>>, %arg3: memref<6x128xf32, #tpu.memory_space<vmem>>, %arg4: memref<8x8xf32, #tpu.memory_space<vmem>>) attributes {dimension_semantics = [#tpu.dimension_semantics<parallel>], iteration_bounds = array<i64: 1>, scalar_prefetch = 0 : i64, scratch_operands = 0 : i64, tpu.core_type = #tpu.core_type<tc>, window_params = [{transform_indices = @transform_0, window_bounds = array<i64: 8, 32>}, {pipeline_mode = #tpu.pipeline_mode<synchronous>, transform_indices = @transform_1, window_bounds = array<i64: 6, 128, 128>}, {pipeline_mode = #tpu.pipeline_mode<synchronous>, transform_indices = @transform_2, window_bounds = array<i64: 6, 128>}, {transform_indices = @transform_3, window_bounds = array<i64: 8, 8>}]} {
    %c0 = arith.constant 0 : index
    %c0_0 = arith.constant 0 : index
    %0 = vector.load %arg1[%c0, %c0_0] : memref<8x32xf32, #tpu.memory_space<vmem>>, vector<8x32xf32>
    %c0_1 = arith.constant 0 : index
    %c0_2 = arith.constant 0 : index
    %c0_3 = arith.constant 0 : index
    %1 = vector.load %arg2[%c0_1, %c0_2, %c0_3] : memref<6x128x128xf32, #tpu.memory_space<vmem>>, vector<1x32x128xf32>
    %2 = vector.shape_cast %1 : vector<1x32x128xf32> to vector<32x128xf32>
    %c0_4 = arith.constant 0 : index
    %c0_5 = arith.constant 0 : index
    %3 = vector.load %arg3[%c0_4, %c0_5] : memref<6x128xf32, #tpu.memory_space<vmem>>, vector<1x128xf32>
    %cst = arith.constant dense<0.000000e+00> : vector<8x128xf32>
    %4 = tpu.matmul %0, %2, %cst {dimension_numbers = #tpu.dot_dimension_numbers<[1], [0], [0], [1], [0, 0, 1, 1], [], []>} : vector<8x32xf32>, vector<32x128xf32>, vector<8x128xf32> -> vector<8x128xf32>
    %5 = vector.broadcast %3 : vector<1x128xf32> to vector<8x128xf32>
    %6 = arith.addf %4, %5 : vector<8x128xf32>
    %cst_6 = arith.constant 0.000000e+00 : f32
    %7 = vector.broadcast %cst_6 : f32 to vector<8x128xf32>
    %8 = arith.maximumf %6, %7 : vector<8x128xf32>
    %c1 = arith.constant 1 : index
    %c0_7 = arith.constant 0 : index
    %c0_8 = arith.constant 0 : index
    %9 = vector.load %arg2[%c1, %c0_7, %c0_8] : memref<6x128x128xf32, #tpu.memory_space<vmem>>, vector<1x128x128xf32>
    %10 = vector.shape_cast %9 : vector<1x128x128xf32> to vector<128x128xf32>
    %c1_9 = arith.constant 1 : index
    %c0_10 = arith.constant 0 : index
    %11 = vector.load %arg3[%c1_9, %c0_10] : memref<6x128xf32, #tpu.memory_space<vmem>>, vector<1x128xf32>
    %cst_11 = arith.constant dense<0.000000e+00> : vector<8x128xf32>
    %12 = tpu.matmul %8, %10, %cst_11 {dimension_numbers = #tpu.dot_dimension_numbers<[1], [0], [0], [1], [0, 0, 1, 1], [], []>} : vector<8x128xf32>, vector<128x128xf32>, vector<8x128xf32> -> vector<8x128xf32>
    %13 = vector.broadcast %11 : vector<1x128xf32> to vector<8x128xf32>
    %14 = arith.addf %12, %13 : vector<8x128xf32>
    %cst_12 = arith.constant 0.000000e+00 : f32
    %15 = vector.broadcast %cst_12 : f32 to vector<8x128xf32>
    %16 = arith.maximumf %14, %15 : vector<8x128xf32>
    %c2 = arith.constant 2 : index
    %c0_13 = arith.constant 0 : index
    %c0_14 = arith.constant 0 : index
    %17 = vector.load %arg2[%c2, %c0_13, %c0_14] : memref<6x128x128xf32, #tpu.memory_space<vmem>>, vector<1x128x128xf32>
    %18 = vector.shape_cast %17 : vector<1x128x128xf32> to vector<128x128xf32>
    %c2_15 = arith.constant 2 : index
    %c0_16 = arith.constant 0 : index
    %19 = vector.load %arg3[%c2_15, %c0_16] : memref<6x128xf32, #tpu.memory_space<vmem>>, vector<1x128xf32>
    %cst_17 = arith.constant dense<0.000000e+00> : vector<8x128xf32>
    %20 = tpu.matmul %16, %18, %cst_17 {dimension_numbers = #tpu.dot_dimension_numbers<[1], [0], [0], [1], [0, 0, 1, 1], [], []>} : vector<8x128xf32>, vector<128x128xf32>, vector<8x128xf32> -> vector<8x128xf32>
    %21 = vector.broadcast %19 : vector<1x128xf32> to vector<8x128xf32>
    %22 = arith.addf %20, %21 : vector<8x128xf32>
    %cst_18 = arith.constant 0.000000e+00 : f32
    %23 = vector.broadcast %cst_18 : f32 to vector<8x128xf32>
    %24 = arith.maximumf %22, %23 : vector<8x128xf32>
    %c3 = arith.constant 3 : index
    %c0_19 = arith.constant 0 : index
    %c0_20 = arith.constant 0 : index
    %25 = vector.load %arg2[%c3, %c0_19, %c0_20] : memref<6x128x128xf32, #tpu.memory_space<vmem>>, vector<1x128x128xf32>
    %26 = vector.shape_cast %25 : vector<1x128x128xf32> to vector<128x128xf32>
    %c3_21 = arith.constant 3 : index
    %c0_22 = arith.constant 0 : index
    %27 = vector.load %arg3[%c3_21, %c0_22] : memref<6x128xf32, #tpu.memory_space<vmem>>, vector<1x128xf32>
    %cst_23 = arith.constant dense<0.000000e+00> : vector<8x128xf32>
    %28 = tpu.matmul %24, %26, %cst_23 {dimension_numbers = #tpu.dot_dimension_numbers<[1], [0], [0], [1], [0, 0, 1, 1], [], []>} : vector<8x128xf32>, vector<128x128xf32>, vector<8x128xf32> -> vector<8x128xf32>
    %29 = vector.broadcast %27 : vector<1x128xf32> to vector<8x128xf32>
    %30 = arith.addf %28, %29 : vector<8x128xf32>
    %cst_24 = arith.constant 0.000000e+00 : f32
    %31 = vector.broadcast %cst_24 : f32 to vector<8x128xf32>
    %32 = arith.maximumf %30, %31 : vector<8x128xf32>
    %c4 = arith.constant 4 : index
    %c0_25 = arith.constant 0 : index
    %c0_26 = arith.constant 0 : index
    %33 = vector.load %arg2[%c4, %c0_25, %c0_26] : memref<6x128x128xf32, #tpu.memory_space<vmem>>, vector<1x128x128xf32>
    %34 = vector.shape_cast %33 : vector<1x128x128xf32> to vector<128x128xf32>
    %c4_27 = arith.constant 4 : index
    %c0_28 = arith.constant 0 : index
    %35 = vector.load %arg3[%c4_27, %c0_28] : memref<6x128xf32, #tpu.memory_space<vmem>>, vector<1x128xf32>
    %cst_29 = arith.constant dense<0.000000e+00> : vector<8x128xf32>
    %36 = tpu.matmul %32, %34, %cst_29 {dimension_numbers = #tpu.dot_dimension_numbers<[1], [0], [0], [1], [0, 0, 1, 1], [], []>} : vector<8x128xf32>, vector<128x128xf32>, vector<8x128xf32> -> vector<8x128xf32>
    %37 = vector.broadcast %35 : vector<1x128xf32> to vector<8x128xf32>
    %38 = arith.addf %36, %37 : vector<8x128xf32>
    %cst_30 = arith.constant 0.000000e+00 : f32
    %39 = vector.broadcast %cst_30 : f32 to vector<8x128xf32>
    %40 = arith.maximumf %38, %39 : vector<8x128xf32>
    %c5 = arith.constant 5 : index
    %c0_31 = arith.constant 0 : index
    %c0_32 = arith.constant 0 : index
    %41 = vector.load %arg2[%c5, %c0_31, %c0_32] : memref<6x128x128xf32, #tpu.memory_space<vmem>>, vector<1x128x128xf32>
    %42 = vector.shape_cast %41 : vector<1x128x128xf32> to vector<128x128xf32>
    %c5_33 = arith.constant 5 : index
    %c0_34 = arith.constant 0 : index
    %43 = vector.load %arg3[%c5_33, %c0_34] : memref<6x128xf32, #tpu.memory_space<vmem>>, vector<1x128xf32>
    %cst_35 = arith.constant dense<0.000000e+00> : vector<8x128xf32>
    %44 = tpu.matmul %40, %42, %cst_35 {dimension_numbers = #tpu.dot_dimension_numbers<[1], [0], [0], [1], [0, 0, 1, 1], [], []>} : vector<8x128xf32>, vector<128x128xf32>, vector<8x128xf32> -> vector<8x128xf32>
    %45 = vector.broadcast %43 : vector<1x128xf32> to vector<8x128xf32>
    %46 = arith.addf %44, %45 : vector<8x128xf32>
    %47 = tpu.iota {dimensions = array<i32: 1>} : vector<8x128xi32>
    %c8_i32 = arith.constant 8 : i32
    %48 = vector.broadcast %c8_i32 : i32 to vector<8x128xi32>
    %49 = arith.cmpi slt, %47, %48 : vector<8x128xi32>
    %cst_36 = arith.constant -1.000000e+30 : f32
    %50 = vector.broadcast %cst_36 : f32 to vector<8x128xf32>
    %51 = arith.select %49, %46, %50 : vector<8x128xi1>, vector<8x128xf32>
    %cst_37 = arith.constant dense<0xFF800000> : vector<8xf32>
    %52 = vector.multi_reduction <maximumf>, %51, %cst_37 [1] : vector<8x128xf32> to vector<8xf32>
    %53 = vector.shape_cast %52 : vector<8xf32> to vector<8x1xf32>
    %54 = vector.broadcast %53 : vector<8x1xf32> to vector<8x128xf32>
    %55 = arith.subf %51, %54 : vector<8x128xf32>
    %56 = math.exp %55 : vector<8x128xf32>
    %cst_38 = arith.constant dense<0.000000e+00> : vector<8xf32>
    %57 = vector.multi_reduction <add>, %56, %cst_38 [1] : vector<8x128xf32> to vector<8xf32>
    %58 = vector.shape_cast %57 : vector<8xf32> to vector<8x1xf32>
    %59 = tpu.reciprocal %58 {approx = true} : vector<8x1xf32> -> vector<8x1xf32>
    %60 = vector.broadcast %59 : vector<8x1xf32> to vector<8x128xf32>
    %61 = arith.mulf %56, %60 : vector<8x128xf32>
    %62 = vector.extract_strided_slice %61 {offsets = [0, 0], sizes = [8, 8], strides = [1, 1]} : vector<8x128xf32> to vector<8x8xf32>
    %c0_39 = arith.constant 0 : index
    %c0_40 = arith.constant 0 : index
    %63 = vector.load %arg4[%c0_39, %c0_40] : memref<8x8xf32, #tpu.memory_space<vmem>>, vector<8x8xf32>
    tpu.vector_store %arg4[%c0_39, %c0_40], %62 {strides = array<i32>} : memref<8x8xf32, #tpu.memory_space<vmem>>, vector<8x8xf32>,
    return
  }
  func.func @transform_0(%arg0: i32) -> (i32, i32) {
    %c0_i32 = arith.constant 0 : i32
    %c0_i32_0 = arith.constant 0 : i32
    return %arg0, %c0_i32 : i32, i32
  }
  func.func @transform_1(%arg0: i32) -> (i32, i32, i32) {
    %c0_i32 = arith.constant 0 : i32
    %c0_i32_0 = arith.constant 0 : i32
    %c0_i32_1 = arith.constant 0 : i32
    %c0_i32_2 = arith.constant 0 : i32
    return %c0_i32, %c0_i32_0, %c0_i32_1 : i32, i32, i32
  }
  func.func @transform_2(%arg0: i32) -> (i32, i32) {
    %c0_i32 = arith.constant 0 : i32
    %c0_i32_0 = arith.constant 0 : i32
    %c0_i32_1 = arith.constant 0 : i32
    return %c0_i32, %c0_i32_0 : i32, i32
  }
  func.func @transform_3(%arg0: i32) -> (i32, i32) {
    %c0_i32 = arith.constant 0 : i32
    %c0_i32_0 = arith.constant 0 : i32
    return %arg0, %c0_i32 : i32, i32
  }
}

</mosaic_0001>

<bundles_post_ra>
// kernel: policy_net_forward.1
= control target key start
LH: loop header
LB: loop body
LE: loop exit
PB: predicated region body
PF: predicated region fallthrough
CT: control target
= control target key end

     0   :  { %8 = vsyncpa [#allocation3], 0  ;;  %s1040_s12 = smov [#allocation2]   ;;  %s1156_s0 = inlined_call_operand.vmem [shape: f32[8,32], index: 0, kind: input, shape index: {}]   ;;  %s1157_s1 = inlined_call_operand.hbm [shape: f32[6,128,128], index: 1, kind: input, shape index: {}]   ;;  %s1158_s2 = inlined_call_operand.vmem [shape: f32[6,128], index: 2, kind: input, shape index: {}]   ;;  %s1159_s3 = inlined_call_operand.vmem [shape: f32[8,8], index: 3, kind: output, shape index: {}]  }
   0x1   :  { %s16_s13 = sshll.u32 %s1040_s12, 4  ;;  %s1016_s16 = scalar_lea.hbm %s1157_s1, 12288  ;;  %s17_s13 = int_to_ptr.vmem [resolvable:$true] %s16_s13 }
   0x2   :  { %p1017_p0 = scmp.ne.s32.totalorder %s1157_s1, %s1016_s16  ;;  %p1020_p1 = scmp.lt.u32.totalorder %s1016_s16, %s1157_s1 }
   0x4   :  { %p1022_p2 = pnand %p1020_p1, %p1017_p0 }
   0x6   :  { %1025 = shalt.err (!%p1022_p2)
}
   0x7   :  { %s1026_s21 = scalar_lea.vmem %s17_s13, 12288  ;;  %p1031_p4 = scmp.lt.s32.totalorder %s17_s13, %s17_s13 }
   0x8   :  { %p1027_p3 = scmp.ne.s32.totalorder %s17_s13, %s1026_s21  ;;  %p1032_p5 = scmp.lt.s32.totalorder %s1026_s21, %s1026_s21 }
   0xa   :  { %p1033_p6 = por %p1032_p5, %p1031_p4 }
   0xc   :  { %p1034_p7 = pnand %p1033_p6, %p1027_p3 }
   0xe   :  { %1037 = shalt.err (!%p1034_p7)
}
   0xf   :  { %s1041_s22 = smov 128   ;;  %s1042_s23 = smov 8  }
  0x10   :  { %22 = dma.hbm_to_vmem [thread:$0]  %s1157_s1, 12288, %s17_s13, [#allocation3], %s1041_s22, %s1041_s22, %s1042_s23  }
  0x11   :  { %1038 = dma.done.wait [#allocation3], 12288  }
  0x12   :  { %1039 = vsyncadd [#allocation3], 4294955008  ;;  %v1043_v0 = vmov 0.0|0.0   ;;  %vm1044_vm0 = vmmov 0   ;;  %v1045_v1 = vmov 0.0   ;;  %v29_v2 = vld [vmem:[#allocation2] sm:$0xff] }
  0x13   :  { %880 = vmatprep.subr.bf16.mxu0 %v1043_v0  ;;  %702 = vmatprep.mubr.msk.f32.mxu0 %vm1044_vm0, %v1045_v1  ;;  %v30_v3 = vld [vmem:[#allocation2 + $0x8] sm:$0xff]  ;;  %v31_v4 = vld [vmem:[#allocation2 + $0x10] sm:$0xff]  ;;  %v32_v6 = vld [vmem:[#allocation2 + $0x18] sm:$0xff]  ;;  %vm38_vm1 = vcmask 261120   ;;  %vm590_vm3 = vcmask 64512  }
  0x14   :  { %886 = vmatprep.subr.bf16.mxu1 %v1043_v0  ;;  %737 = vmatprep.mubr.msk.f32.mxu1 %vm1044_vm0, %v1045_v1  ;;  %v881_v5 = vpack.c.bf16 %v30_v3, %v29_v2  ;;  %v114_v7 = vld [vmem:[#allocation2 + $0x80] sm:$0xff]  ;;  %v115_v8 = vld [vmem:[#allocation2 + $0x88] sm:$0xff]  ;;  %v116_v9 = vld [vmem:[#allocation2 + $0x90] sm:$0xff]  ;;  %v884_v11 = vpack.c.bf16 %v32_v6, %v31_v4 }
  0x15   :  { %v117_v10 = vld [vmem:[#allocation2 + $0x98] sm:$0xff]  ;;  %v887_v12 = vpack.c.bf16 %v115_v8, %v114_v7  ;;  %v118_v14 = vld [vmem:[#allocation2 + $0xa0] sm:$0xff]  ;;  %v119_v15 = vld [vmem:[#allocation2 + $0xa8] sm:$0xff] }
  0x16   :  { %882 = vmatpush3.bf16.msra.mxu0 %v881_v5  ;;  %v890_v13 = vpack.c.bf16 %v117_v10, %v116_v9  ;;  %v28_v16 = vld [vmem:[%s1156_s0] sm:$0xff]  ;;  %v893_v17 = vpack.c.bf16 %v119_v15, %v118_v14  ;;  %v120_v18 = vld [vmem:[#allocation2 + $0xb0] sm:$0xff]  ;;  %v122_v21 = vld [vmem:[#allocation2 + $0xc0] sm:$0xff] }
  0x17   :  { %883 = vmatprep.subr.bf16.mxu0 %v1043_v0  ;;  %888 = vmatpush3.bf16.msra.mxu1 %v887_v12  ;;  %v121_v19 = vld [vmem:[#allocation2 + $0xb8] sm:$0xff]  ;;  %v123_v22 = vld [vmem:[#allocation2 + $0xc8] sm:$0xff]  ;;  %v124_v24 = vld [vmem:[#allocation2 + $0xd0] sm:$0xff] }
  0x18   :  { %889 = vmatprep.subr.bf16.mxu1 %v1043_v0  ;;  %v896_v20 = vpack.c.bf16 %v121_v19, %v120_v18  ;;  %v899_v23 = vpack.c.bf16 %v123_v22, %v122_v21  ;;  %v125_v25 = vld [vmem:[#allocation2 + $0xd8] sm:$0xff]  ;;  %v126_v27 = vld [vmem:[#allocation2 + $0xe0] sm:$0xff]  ;;  %v127_v28 = vld [vmem:[#allocation2 + $0xe8] sm:$0xff] }
  0x19   :  { %v902_v26 = vpack.c.bf16 %v125_v25, %v124_v24  ;;  %v905_v29 = vpack.c.bf16 %v127_v28, %v126_v27  ;;  %v128_v30 = vld [vmem:[#allocation2 + $0xf0] sm:$0xff]  ;;  %v129_v31 = vld [vmem:[#allocation2 + $0xf8] sm:$0xff]  ;;  %v207_v33 = vld [vmem:[#allocation2 + $0x100] sm:$0xff] }
  0x1a   :  { %885 = vmatpush3.bf16.msra.mxu0 %v884_v11  ;;  %v908_v32 = vpack.c.bf16 %v129_v31, %v128_v30  ;;  %v208_v34 = vld [vmem:[#allocation2 + $0x108] sm:$0xff]  ;;  %v209_v35 = vld [vmem:[#allocation2 + $0x110] sm:$0xff]  ;;  %v210_v37 = vld [vmem:[#allocation2 + $0x118] sm:$0xff] }
  0x1b   :  { %910 = vmatprep.subr.bf16.mxu0 %v1043_v0  ;;  %891 = vmatpush3.bf16.msra.mxu1 %v890_v13  ;;  %v911_v36 = vpack.c.bf16 %v208_v34, %v207_v33  ;;  %v914_v38 = vpack.c.bf16 %v210_v37, %v209_v35  ;;  %v211_v39 = vld [vmem:[#allocation2 + $0x120] sm:$0xff]  ;;  %v212_v40 = vld [vmem:[#allocation2 + $0x128] sm:$0xff]  ;;  %v213_v42 = vld [vmem:[#allocation2 + $0x130] sm:$0xff] }
  0x1c   :  { %892 = vmatprep.subr.bf16.mxu1 %v1043_v0  ;;  %v917_v41 = vpack.c.bf16 %v212_v40, %v211_v39  ;;  %v214_v43 = vld [vmem:[#allocation2 + $0x138] sm:$0xff]  ;;  %v215_v45 = vld [vmem:[#allocation2 + $0x140] sm:$0xff]  ;;  %v216_v46 = vld [vmem:[#allocation2 + $0x148] sm:$0xff] }
  0x1d   :  { %703 = vmatmul.mubr.msk.f32.vlgmr.msra.gmra.mrb[0].mxu0 %vm38_vm1, %v28_v16  ;;  %v920_v44 = vpack.c.bf16 %v214_v43, %v213_v42  ;;  %v923_v47 = vpack.c.bf16 %v216_v46, %v215_v45  ;;  %v217_v48 = vld [vmem:[#allocation2 + $0x150] sm:$0xff]  ;;  %v218_v49 = vld [vmem:[#allocation2 + $0x158] sm:$0xff]  ;;  %v219_v51 = vld [vmem:[#allocation2 + $0x160] sm:$0xff] }
  0x1e   :  { %772 = vmatprep.mubr.msk.f32.mxu0 %vm1044_vm0, %v1045_v1  ;;  %912 = vmatpush3.bf16.msra.mxu0 %v911_v36  ;;  %v926_v50 = vpack.c.bf16 %v218_v49, %v217_v48  ;;  %v220_v52 = vld [vmem:[#allocation2 + $0x168] sm:$0xff]  ;;  %v597_v54 = vld [vmem:[%s1158_s2] ss:$0 sm:$0xff]  ;;  %v221_v59 = vld [vmem:[#allocation2 + $0x170] sm:$0xff] }
  0x1f   :  { %894 = vmatpush3.bf16.msra.mxu1 %v893_v17  ;;  %913 = vmatprep.subr.bf16.mxu0 %v1043_v0  ;;  %v929_v53 = vpack.c.bf16 %v220_v52, %v219_v51  ;;  %v222_v60 = vld [vmem:[#allocation2 + $0x178] sm:$0xff]  ;;  %v300_v62 = vld [vmem:[#allocation2 + $0x180] sm:$0xff]  ;;  %v301_v63 = vld [vmem:[#allocation2 + $0x188] sm:$0xff] }
  0x20   :  { %895 = vmatprep.subr.bf16.mxu1 %v1043_v0  ;;  %v932_v61 = vpack.c.bf16 %v222_v60, %v221_v59  ;;  %v302_v2 = vld [vmem:[#allocation2 + $0x190] sm:$0xff]  ;;  %v935_v3 = vpack.c.bf16 %v301_v63, %v300_v62  ;;  %v303_v4 = vld [vmem:[#allocation2 + $0x198] sm:$0xff]  ;;  %v304_v6 = vld [vmem:[#allocation2 + $0x1a0] sm:$0xff] }
  0x21   :  { %v938_v5 = vpack.c.bf16 %v303_v4, %v302_v2  ;;  %v305_v7 = vld [vmem:[#allocation2 + $0x1a8] sm:$0xff]  ;;  %v306_v9 = vld [vmem:[#allocation2 + $0x1b0] sm:$0xff]  ;;  %v307_v10 = vld [vmem:[#allocation2 + $0x1b8] sm:$0xff] }
  0x22   :  { %915 = vmatpush3.bf16.msra.mxu0 %v914_v38  ;;  %v941_v8 = vpack.c.bf16 %v305_v7, %v304_v6  ;;  %v944_v11 = vpack.c.bf16 %v307_v10, %v306_v9  ;;  %v308_v12 = vld [vmem:[#allocation2 + $0x1c0] sm:$0xff]  ;;  %v309_v13 = vld [vmem:[#allocation2 + $0x1c8] sm:$0xff]  ;;  %v310_v15 = vld [vmem:[#allocation2 + $0x1d0] sm:$0xff] }
  0x23   :  { %897 = vmatpush3.bf16.msra.mxu1 %v896_v20  ;;  %916 = vmatprep.subr.bf16.mxu0 %v1043_v0  ;;  %v947_v14 = vpack.c.bf16 %v309_v13, %v308_v12  ;;  %v311_v16 = vld [vmem:[#allocation2 + $0x1d8] sm:$0xff]  ;;  %v312_v18 = vld [vmem:[#allocation2 + $0x1e0] sm:$0xff]  ;;  %v313_v19 = vld [vmem:[#allocation2 + $0x1e8] sm:$0xff] }
  0x24   :  { %898 = vmatprep.subr.bf16.mxu1 %v1043_v0  ;;  %v950_v17 = vpack.c.bf16 %v311_v16, %v310_v15  ;;  %v953_v20 = vpack.c.bf16 %v313_v19, %v312_v18  ;;  %v599_v21 = vld [vmem:[%s1158_s2 + $0x1] ss:$0 sm:$0xff]  ;;  %v394_v30 = vld [vmem:[#allocation2 + $0x208] sm:$0xff]  ;;  %v395_v31 = vld [vmem:[#allocation2 + $0x210] sm:$0xff] }
  0x25   :  { %v315_v27 = vld [vmem:[#allocation2 + $0x1f8] sm:$0xff]  ;;  %v397_v35 = vld [vmem:[#allocation2 + $0x220] sm:$0xff]  ;;  %v398_v36 = vld [vmem:[#allocation2 + $0x228] sm:$0xff] }
  0x26   :  { %918 = vmatpush3.bf16.msra.mxu0 %v917_v41  ;;  %v396_v33 = vld [vmem:[#allocation2 + $0x218] sm:$0xff]  ;;  %v965_v37 = vpack.c.bf16 %v398_v36, %v397_v35  ;;  %v399_v38 = vld [vmem:[#allocation2 + $0x230] sm:$0xff]  ;;  %v401_v41 = vld [vmem:[#allocation2 + $0x240] sm:$0xff] }
  0x27   :  { %900 = vmatpush3.bf16.msra.mxu1 %v899_v23  ;;  %919 = vmatprep.subr.bf16.mxu0 %v1043_v0  ;;  %v962_v34 = vpack.c.bf16 %v396_v33, %v395_v31  ;;  %v400_v39 = vld [vmem:[#allocation2 + $0x238] sm:$0xff]  ;;  %v402_v42 = vld [vmem:[#allocation2 + $0x248] sm:$0xff]  ;;  %v488_v60 = vld [vmem:[#allocation2 + $0x290] sm:$0xff] }
  0x28   :  { %901 = vmatprep.subr.bf16.mxu1 %v1043_v0  ;;  %v968_v40 = vpack.c.bf16 %v400_v39, %v399_v38  ;;  %v971_v43 = vpack.c.bf16 %v402_v42, %v401_v41  ;;  %v404_v45 = vld [vmem:[#allocation2 + $0x258] sm:$0xff]  ;;  %v406_v48 = vld [vmem:[#allocation2 + $0x268] sm:$0xff]  ;;  %v490_v2 = vld [vmem:[#allocation2 + $0x2a0] sm:$0xff] }
  0x29   :  { %v487_v59 = vld [vmem:[#allocation2 + $0x288] sm:$0xff]  ;;  %v489_v62 = vld [vmem:[#allocation2 + $0x298] sm:$0xff]  ;;  %v494_v7 = vld [vmem:[#allocation2 + $0x2c0] sm:$0xff] }
  0x2a   :  { %921 = vmatpush3.bf16.msra.mxu0 %v920_v44  ;;  %v403_v44 = vld [vmem:[#allocation2 + $0x250] sm:$0xff]  ;;  %v986_v63 = vpack.c.bf16 %v489_v62, %v488_v60  ;;  %v498_v13 = vld [vmem:[#allocation2 + $0x2e0] sm:$0xff]  ;;  %v601_v16 = vld [vmem:[%s1158_s2 + $0x3] ss:$0 sm:$0xff] }
  0x2b   :  { %903 = vmatpush3.bf16.msra.mxu1 %v902_v26  ;;  %922 = vmatprep.subr.bf16.mxu0 %v1043_v0  ;;  %v314_v26 = vld [vmem:[#allocation2 + $0x1f0] sm:$0xff]  ;;  %v974_v46 = vpack.c.bf16 %v404_v45, %v403_v44 }
  0x2c   :  { %904 = vmatprep.subr.bf16.mxu1 %v1043_v0  ;;  %v956_v28 = vpack.c.bf16 %v315_v27, %v314_v26  ;;  %v496_v10 = vld [vmem:[#allocation2 + $0x2d0] sm:$0xff] }
  0x2e   :  { %924 = vmatpush3.bf16.msra.mxu0 %v923_v47  ;;  %v405_v47 = vld [vmem:[#allocation2 + $0x260] sm:$0xff] }
  0x2f   :  { %906 = vmatpush3.bf16.msra.mxu1 %v905_v29  ;;  %925 = vmatprep.subr.bf16.mxu0 %v1043_v0  ;;  %v393_v29 = vld [vmem:[#allocation2 + $0x200] sm:$0xff]  ;;  %v977_v49 = vpack.c.bf16 %v406_v48, %v405_v47 }
  0x30   :  { %907 = vmatprep.subr.bf16.mxu1 %v1043_v0 }
  0x32   :  { %927 = vmatpush3.bf16.msra.mxu0 %v926_v50  ;;  %v600_v50 = vld [vmem:[%s1158_s2 + $0x2] ss:$0 sm:$0xff] }
  0x33   :  { %909 = vmatpush3.bf16.msra.mxu1 %v908_v32  ;;  %928 = vmatprep.subr.bf16.mxu0 %v1043_v0  ;;  %v959_v32 = vpack.c.bf16 %v394_v30, %v393_v29  ;;  %v603_v30 = vld [vmem:[%s1158_s2 + $0x5] ss:$0 sm:$0xff] }
  0x34   :  { %934 = vmatprep.subr.bf16.mxu1 %v1043_v0 }
  0x36   :  { %930 = vmatpush3.bf16.msra.mxu0 %v929_v53 }
  0x37   :  { %931 = vmatprep.subr.bf16.mxu0 %v1043_v0 }
  0x3a   :  { %933 = vmatpush3.bf16.msra.mxu0 %v932_v61 }
  0x3b   :  { %958 = vmatprep.subr.bf16.mxu0 %v1043_v0 }
  0xf0   :  { %v108_v55 = vpop.f32.mrb[0].mxu0 }
  0xf1   :  { %v109_v56 = vadd.f32 %v597_v54, %v108_v55  ;;  %v704_v57 = vpop.f32.mrb[1].mxu0  ;;  %v407_v55 = vld [vmem:[#allocation2 + $0x270] sm:$0xff] }
  0xf3   :  { %v112_v58 = vmax.f32 %v109_v56, 0.0  ;;  %v408_v56 = vld [vmem:[#allocation2 + $0x278] sm:$0xff] }
  0xf4   :  { %v980_v57 = vpack.c.bf16 %v408_v56, %v407_v55 }
  0xf5   :  { %738 = vmatmul.mubr.f32.vlgmr.msra.gmra.mrb[0].mxu1 %v112_v58  ;;  %v486_v58 = vld [vmem:[#allocation2 + $0x280] sm:$0xff] }
  0xf6   :  { %807 = vmatprep.mubr.msk.f32.mxu1 %vm1044_vm0, %v1045_v1  ;;  %936 = vmatpush3.bf16.msra.mxu1 %v935_v3  ;;  %v983_v61 = vpack.c.bf16 %v487_v59, %v486_v58  ;;  %v491_v3 = vld [vmem:[#allocation2 + $0x2a8] sm:$0xff] }
  0xf7   :  { %937 = vmatprep.subr.bf16.mxu1 %v1043_v0  ;;  %v989_v4 = vpack.c.bf16 %v491_v3, %v490_v2 }
  0xfa   :  { %939 = vmatpush3.bf16.msra.mxu1 %v938_v5  ;;  %v493_v5 = vld [vmem:[#allocation2 + $0x2b8] sm:$0xff] }
  0xfb   :  { %940 = vmatprep.subr.bf16.mxu1 %v1043_v0 }
  0xfe   :  { %942 = vmatpush3.bf16.msra.mxu1 %v941_v8  ;;  %v495_v8 = vld [vmem:[#allocation2 + $0x2c8] sm:$0xff] }
  0xff   :  { %943 = vmatprep.subr.bf16.mxu1 %v1043_v0  ;;  %v995_v9 = vpack.c.bf16 %v495_v8, %v494_v7 }
 0x102   :  { %945 = vmatpush3.bf16.msra.mxu1 %v944_v11  ;;  %v497_v11 = vld [vmem:[#allocation2 + $0x2d8] sm:$0xff] }
 0x103   :  { %946 = vmatprep.subr.bf16.mxu1 %v1043_v0  ;;  %v998_v12 = vpack.c.bf16 %v497_v11, %v496_v10 }
 0x106   :  { %948 = vmatpush3.bf16.msra.mxu1 %v947_v14  ;;  %v499_v14 = vld [vmem:[#allocation2 + $0x2e8] sm:$0xff] }
 0x107   :  { %949 = vmatprep.subr.bf16.mxu1 %v1043_v0  ;;  %v1001_v15 = vpack.c.bf16 %v499_v14, %v498_v13 }
 0x10a   :  { %951 = vmatpush3.bf16.msra.mxu1 %v950_v17 }
 0x10b   :  { %952 = vmatprep.subr.bf16.mxu1 %v1043_v0 }
 0x10e   :  { %954 = vmatpush3.bf16.msra.mxu1 %v953_v20 }
 0x10f   :  { %955 = vmatprep.subr.bf16.mxu1 %v1043_v0 }
 0x112   :  { %957 = vmatpush3.bf16.msra.mxu1 %v956_v28  ;;  %v577_v28 = vlaneseq }
 0x113   :  { %982 = vmatprep.subr.bf16.mxu1 %v1043_v0 }
 0x114   :  { %v578_v29 = vand.u32 127, %v577_v28 }
 0x116   :  { %vm579_vm2 = vcmp.lt.s32.totalorder %v578_v29, 8 }
 0x1c8   :  { %v201_v22 = vpop.f32.mrb[0].mxu1 }
 0x1c9   :  { %v202_v23 = vadd.f32 %v599_v21, %v201_v22  ;;  %v739_v24 = vpop.f32.mrb[1].mxu1  ;;  %v500_v21 = vld [vmem:[#allocation2 + $0x2f0] sm:$0xff]  ;;  %v501_v22 = vld [vmem:[#allocation2 + $0x2f8] sm:$0xff] }
 0x1ca   :  { %v602_v24 = vld [vmem:[%s1158_s2 + $0x4] ss:$0 sm:$0xff] }
 0x1cb   :  { %v205_v25 = vmax.f32 %v202_v23, 0.0  ;;  %v1004_v23 = vpack.c.bf16 %v501_v22, %v500_v21 }
 0x1cd   :  { %773 = vmatmul.mubr.f32.vlgmr.msra.gmra.mrb[2].mxu0 %v205_v25 }
 0x1ce   :  { %842 = vmatprep.mubr.msk.f32.mxu0 %vm1044_vm0, %v1045_v1  ;;  %960 = vmatpush3.bf16.msra.mxu0 %v959_v32 }
 0x1cf   :  { %961 = vmatprep.subr.bf16.mxu0 %v1043_v0 }
 0x1d2   :  { %963 = vmatpush3.bf16.msra.mxu0 %v962_v34 }
 0x1d3   :  { %964 = vmatprep.subr.bf16.mxu0 %v1043_v0 }
 0x1d6   :  { %966 = vmatpush3.bf16.msra.mxu0 %v965_v37 }
 0x1d7   :  { %967 = vmatprep.subr.bf16.mxu0 %v1043_v0 }
 0x1da   :  { %969 = vmatpush3.bf16.msra.mxu0 %v968_v40 }
 0x1db   :  { %970 = vmatprep.subr.bf16.mxu0 %v1043_v0 }
 0x1de   :  { %972 = vmatpush3.bf16.msra.mxu0 %v971_v43 }
 0x1df   :  { %973 = vmatprep.subr.bf16.mxu0 %v1043_v0 }
 0x1e2   :  { %975 = vmatpush3.bf16.msra.mxu0 %v974_v46 }
 0x1e3   :  { %976 = vmatprep.subr.bf16.mxu0 %v1043_v0 }
 0x1e6   :  { %978 = vmatpush3.bf16.msra.mxu0 %v977_v49 }
 0x1e7   :  { %979 = vmatprep.subr.bf16.mxu0 %v1043_v0 }
 0x1ea   :  { %981 = vmatpush3.bf16.msra.mxu0 %v980_v57 }
 0x2a0   :  { %v294_v51 = vpop.f32.mrb[2].mxu0 }
 0x2a1   :  { %v295_v52 = vadd.f32 %v600_v50, %v294_v51  ;;  %v774_v53 = vpop.f32.mrb[3].mxu0 }
 0x2a3   :  { %v298_v54 = vmax.f32 %v295_v52, 0.0 }
 0x2a5   :  { %808 = vmatmul.mubr.f32.vlgmr.msra.gmra.mrb[2].mxu1 %v298_v54 }
 0x2a6   :  { %877 = vmatprep.mubr.msk.f32.mxu1 %vm1044_vm0, %v1045_v1  ;;  %984 = vmatpush3.bf16.msra.mxu1 %v983_v61  ;;  %v492_v1 = vld [vmem:[#allocation2 + $0x2b0] sm:$0xff] }
 0x2a7   :  { %985 = vmatprep.subr.bf16.mxu1 %v1043_v0  ;;  %v992_v6 = vpack.c.bf16 %v493_v5, %v492_v1 }
 0x2aa   :  { %987 = vmatpush3.bf16.msra.mxu1 %v986_v63 }
 0x2ab   :  { %988 = vmatprep.subr.bf16.mxu1 %v1043_v0 }
 0x2ae   :  { %990 = vmatpush3.bf16.msra.mxu1 %v989_v4 }
 0x2af   :  { %991 = vmatprep.subr.bf16.mxu1 %v1043_v0 }
 0x2b2   :  { %993 = vmatpush3.bf16.msra.mxu1 %v992_v6 }
 0x2b3   :  { %994 = vmatprep.subr.bf16.mxu1 %v1043_v0 }
 0x2b6   :  { %996 = vmatpush3.bf16.msra.mxu1 %v995_v9 }
 0x2b7   :  { %997 = vmatprep.subr.bf16.mxu1 %v1043_v0 }
 0x2ba   :  { %999 = vmatpush3.bf16.msra.mxu1 %v998_v12 }
 0x2bb   :  { %1000 = vmatprep.subr.bf16.mxu1 %v1043_v0 }
 0x2be   :  { %1002 = vmatpush3.bf16.msra.mxu1 %v1001_v15 }
 0x2bf   :  { %1003 = vmatprep.subr.bf16.mxu1 %v1043_v0 }
 0x2c2   :  { %1005 = vmatpush3.bf16.msra.mxu1 %v1004_v23 }
 0x378   :  { %v387_v17 = vpop.f32.mrb[2].mxu1 }
 0x379   :  { %v388_v18 = vadd.f32 %v601_v16, %v387_v17  ;;  %v809_v19 = vpop.f32.mrb[3].mxu1 }
 0x37b   :  { %v391_v20 = vmax.f32 %v388_v18, 0.0 }
 0x37d   :  { %843 = vmatmul.mubr.f32.vlgmr.msra.gmra.mrb[4].mxu0 %v391_v20 }
 0x450   :  { %v480_v25 = vpop.f32.mrb[4].mxu0 }
 0x451   :  { %v481_v26 = vadd.f32 %v602_v24, %v480_v25  ;;  %v844_v0 = vpop.f32.mrb[5].mxu0 }
 0x453   :  { %v484_v27 = vmax.f32 %v481_v26, 0.0 }
 0x455   :  { %878 = vmatmul.mubr.f32.vlgmr.msra.gmra.mrb[4].mxu1 %v484_v27 }
 0x528   :  { %v573_v31 = vpop.f32.mrb[4].mxu1 }
 0x529   :  { %v574_v32 = vadd.f32 %v603_v30, %v573_v31  ;;  %v879_v33 = vpop.f32.mrb[5].mxu1 }
 0x52b   :  { %v580_v34 = vsel %vm579_vm2, %v574_v32, -1e+30 }
 0x52c   :  { %581 = vmax.xlane.f32.xlu0 %v580_v34 }
 0x5b9   :  { %v582_v35 = vpop.xlane.xlu0 %581 }
 0x5ba   :  { %v583_v36 = vsub.f32 %v580_v34, %v582_v35 }
 0x5bc   :  { %v584_v37 = vmul.f32 1.442695, %v583_v36 }
 0x5be   :  { %1012 = vpow2.f32 %v584_v37 }
 0x5c8   :  { %v1013_v38 = vpop.eup %1012 }
 0x5c9   :  { %586 = vadd.xlane.f32.xlu0 %v1013_v38 }
 0x656   :  { %v587_v39 = vpop.xlane.xlu0 %586 }
 0x657   :  { %1014 = vrcp.f32 %v587_v39 }
 0x661   :  { %v1015_v40 = vpop.eup %1014 }
 0x662   :  { %v589_v41 = vmul.f32 %v1015_v40, %v1013_v38 }
 0x664   :  { %591 = vst.msk [vmem:[%s1159_s3] sm:$0xff] %vm590_vm3, %v589_v41 }
 0x665   :  { %596 = vsyncpa [#allocation3], 1 }

</bundles_post_ra>
